<compile_context>
chip_gen: v7x
topology: tpu7x:2x2x1
jax: 0.10.0
libtpu: 0.0.40
codegen_flags: <defaults>
</compile_context>

<pallas_src>
import functools
import math

import jax
import jax.numpy as jnp
from jax.experimental import pallas as pl
from jax.experimental.pallas import tpu as pltpu

LANES = 128
SUBLANES = 8
STRIP_R = 512         # rows per inner strip: 512*128*4B = 256 KiB f32 temporaries
ACC_R = 64            # accumulator rows: 8 vregs -> 8 independent VALU add chains
BLOCK_R_MAX = 8192    # rows per grid step: 8192*128*4B = 4 MiB per f32 input block
_LOG2 = math.log(2.0)


def _round_up(x, m):
    return ((x + m - 1) // m) * m


def _num_tensorcores():
    """Best-effort TensorCore count of the local chip (v7x: 2, v5e/v6e: 1)."""
    try:
        info = pltpu.get_tpu_info()
        for name in ("num_cores", "num_tensorcores", "tensorcore_count",
                     "cores_per_chip", "num_cores_per_chip"):
            v = getattr(info, name, None)
            if isinstance(v, int) and v >= 1:
                return max(1, min(int(v), 2))
    except Exception:
        pass
    return 1


def _elementwise_loss(d, loss_type):
    if loss_type == "mse":
        return d * d
    if loss_type == "mae":
        return jnp.abs(d)
    if loss_type == "log_cosh":
        # Stable log(cosh(d)) = |d| + log1p(exp(-2|d|)) - log(2); no f32 overflow.
        ad = jnp.abs(d)
        return ad + jnp.log1p(jnp.exp(-2.0 * ad)) - _LOG2
    raise NotImplementedError(f"Loss function [{loss_type}] is not implemented")


def _loss_partial_kernel(yp_ref, y_ref, out_ref, *, loss_type, block_r,
                         full_blocks, tail_limit, blocks_per_shard, branching):
    i = pl.program_id(1)

    # Zero this shard's resident (1, ACC_R, 128) accumulator on its first step.
    @pl.when(i == 0)
    def _():
        out_ref[...] = jnp.zeros_like(out_ref)

    n_strips = block_r // STRIP_R
    chunks = STRIP_R // ACC_R

    def accumulate(limit):
        # Strip-mine the (block_r, 128) block: caps VMEM temporaries and folds
        # each strip into an (ACC_R, 128) slab with VPU adds only (no per-step
        # cross-lane reduce); the final reduce happens once in the wrapper.
        def strip(j, acc):
            r0 = j * STRIP_R
            rs = pl.multiple_of(r0, STRIP_R)
            # Cast in-kernel so HBM traffic stays at the inputs' native width.
            d = (yp_ref[pl.ds(rs, STRIP_R), :].astype(jnp.float32)
                 - y_ref[pl.ds(rs, STRIP_R), :].astype(jnp.float32))
            if limit is not None:
                # Zero rows past the valid range.  Masking d (not v) keeps DMA
                # padding garbage out of the nonlinearity (loss(0) == 0).
                row = jax.lax.broadcasted_iota(jnp.int32, d.shape, 0)
                d = jnp.where(row < (limit - r0), d, 0.0)
            v = _elementwise_loss(d, loss_type)
            part = v[0:ACC_R, :]
            for t in range(1, chunks):
                part = part + v[t * ACC_R:(t + 1) * ACC_R, :]
            return acc + part

        acc = jax.lax.fori_loop(0, n_strips, strip,
                                jnp.zeros((ACC_R, LANES), jnp.float32),
                                unroll=True)
        out_ref[...] += acc[None, :, :]

    if not branching:
        # Every block is full and exactly covered: single mask-free path.
        accumulate(None)
    else:
        blk = pl.program_id(0) * blocks_per_shard + i
        if full_blocks > 0:
            @pl.when(blk < full_blocks)
            def _():
                accumulate(None)            # interior blocks: no mask
        if tail_limit is not None:
            @pl.when(blk == full_blocks)
            def _():
                accumulate(tail_limit)      # the single partial tail block
        # blk > full_blocks: over-coverage step of a sharded grid -> skipped
        # entirely (its DMA is clamped to a valid block by the index_map).


def pallas_loss(y_pred, y, loss_type, num_shards=None):
    """Equivalent of Loss(loss_type)(y_pred, y): scalar mean over all elements."""
    assert y_pred.shape == y.shape
    n = int(y_pred.size)

    yp = jnp.ravel(y_pred)
    yt = jnp.ravel(y)

    # Only pad when n is not lane-aligned (reshape requirement).  Zero padding
    # contributes exactly 0 to all supported losses; ragged *row* counts are
    # handled in-kernel by the masked tail block, so no 8x128 pad copy.
    n_pad = _round_up(n, LANES)
    if n_pad != n:
        yp = jnp.pad(yp, (0, n_pad - n))
        yt = jnp.pad(yt, (0, n_pad - n))
    rows = n_pad // LANES
    yp = yp.reshape(rows, LANES)
    yt = yt.reshape(rows, LANES)

    # Block size: a multiple of STRIP_R, capped at BLOCK_R_MAX; medium tensors
    # get ~4 blocks so the BlockSpec pipeline overlaps DMA with compute.
    if rows >= 4 * BLOCK_R_MAX:
        block_r = BLOCK_R_MAX
    elif rows >= 4 * STRIP_R:
        block_r = _round_up(pl.cdiv(rows, 4), STRIP_R)
    else:
        block_r = _round_up(rows, STRIP_R)

    total_blocks = pl.cdiv(rows, block_r)
    full_blocks = rows // block_r
    tail_limit = (rows - full_blocks * block_r) if full_blocks != total_blocks else None

    if num_shards is None:
        num_shards = _num_tensorcores()
    num_shards = max(1, min(int(num_shards), total_blocks))
    blocks_per_shard = pl.cdiv(total_blocks, num_shards)
    coverage = num_shards * blocks_per_shard
    branching = (tail_limit is not None) or (coverage > total_blocks)

    if coverage == total_blocks:
        def in_index(c, i):
            return (c * blocks_per_shard + i, 0)
    else:
        def in_index(c, i):
            # Clamp over-coverage steps to a valid block so no OOB DMA is
            # issued; their compute is skipped inside the kernel.
            return (jnp.minimum(c * blocks_per_shard + i, total_blocks - 1), 0)

    kernel = functools.partial(
        _loss_partial_kernel, loss_type=loss_type, block_r=block_r,
        full_blocks=full_blocks, tail_limit=tail_limit,
        blocks_per_shard=blocks_per_shard, branching=branching)

    bytes_in = n * (y_pred.dtype.itemsize + y.dtype.itemsize)
    cost = pl.CostEstimate(
        flops=4 * n,
        transcendentals=(2 * n) if loss_type == "log_cosh" else 0,
        bytes_accessed=bytes_in + num_shards * ACC_R * LANES * 4)

    shard_sem = pltpu.CORE_PARALLEL if num_shards > 1 else pltpu.ARBITRARY

    partials = pl.pallas_call(
        kernel,
        out_shape=jax.ShapeDtypeStruct((num_shards, ACC_R, LANES), jnp.float32),
        grid_spec=pltpu.PrefetchScalarGridSpec(
            num_scalar_prefetch=0,
            grid=(num_shards, blocks_per_shard),
            in_specs=[
                pl.BlockSpec((block_r, LANES), in_index),
                pl.BlockSpec((block_r, LANES), in_index),
            ],
            out_specs=pl.BlockSpec((1, ACC_R, LANES), lambda c, i: (c, 0, 0)),
        ),
        compiler_params=pltpu.CompilerParams(
            dimension_semantics=(shard_sem, pltpu.ARBITRARY),
            vmem_limit_bytes=48 * 1024 * 1024),
        cost_estimate=cost,
    )(yp, yt)

    # Single cross-lane/sublane reduce, once, outside the kernel.
    return jnp.sum(partials) / n


def _reference_loss(y_pred, y, loss_type):
    d = y_pred.astype(jnp.float32) - y.astype(jnp.float32)
    if loss_type == "mse":
        return jnp.mean(d * d)
    if loss_type == "mae":
        return jnp.mean(jnp.abs(d))
    return jnp.mean(jnp.log(jnp.cosh(d)))


if __name__ == "__main__":
    key = jax.random.PRNGKey(0)
    loss_fn = jax.jit(pallas_loss, static_argnames=("loss_type", "num_shards"))

    ok = True
    # Primary small NCHW shape (all losses), a ragged shape (pad + masked tail
    # path) and a larger shape (multi-block pipelined + masked tail path).
    cases = [
        ((2, 4, 16, 16), ("mse", "mae", "log_cosh")),
        ((3, 5, 17, 19), ("mse", "log_cosh")),
        ((2, 4, 320, 320), ("mse",)),
    ]
    for shape, losses in cases:
        k1, k2 = jax.random.split(jax.random.fold_in(key, sum(shape)))
        y_pred = jax.random.normal(k1, shape, dtype=jnp.float32)
        y = jax.random.normal(k2, shape, dtype=jnp.float32)
        for loss_type in losses:
            out = jax.block_until_ready(loss_fn(y_pred, y, loss_type=loss_type))
            ref = jax.block_until_ready(_reference_loss(y_pred, y, loss_type))
            if not jnp.allclose(out, ref, atol=1e-5, rtol=1e-4):
                ok = False
                print(f"MISMATCH shape={shape} {loss_type}: {out} vs {ref}")

    if ok:
        print("KERNEL_OK")
</pallas_src>

<mosaic_0001>
module attributes {stable_mosaic.version = 11 : i64} {
  func.func @_loss_partial_kernel(%arg0: i32, %arg1: i32, %arg2: memref<512x128xf32, #tpu.memory_space<vmem>>, %arg3: memref<512x128xf32, #tpu.memory_space<vmem>>, %arg4: memref<1x64x128xf32, #tpu.memory_space<vmem>>) attributes {dimension_semantics = [#tpu.dimension_semantics<arbitrary>, #tpu.dimension_semantics<arbitrary>], iteration_bounds = array<i64: 1, 1>, scalar_prefetch = 0 : i64, scratch_operands = 0 : i64, tpu.core_type = #tpu.core_type<tc>, window_params = [{transform_indices = @transform_0, window_bounds = array<i64: 512, 128>}, {transform_indices = @transform_1, window_bounds = array<i64: 512, 128>}, {transform_indices = @transform_2, window_bounds = array<i64: 1, 64, 128>}]} {
    %c0_i32 = arith.constant 0 : i32
    %0 = arith.cmpi eq, %arg1, %c0_i32 : i32
    %1 = arith.extui %0 : i1 to i32
    %c0_i32_0 = arith.constant 0 : i32
    %2 = arith.cmpi ne, %1, %c0_i32_0 : i32
    scf.if %2 {
      %cst = arith.constant 0.000000e+00 : f32
      %8 = vector.broadcast %cst : f32 to vector<1x64x128xf32>
      %c0 = arith.constant 0 : index
      %c0_3 = arith.constant 0 : index
      %c0_4 = arith.constant 0 : index
      %9 = vector.load %arg4[%c0, %c0_3, %c0_4] : memref<1x64x128xf32, #tpu.memory_space<vmem>>, vector<1x64x128xf32>
      tpu.vector_store %arg4[%c0, %c0_3, %c0_4], %8 {strides = array<i32>} : memref<1x64x128xf32, #tpu.memory_space<vmem>>, vector<1x64x128xf32>,
    } else {
    }
    %c1_i32 = arith.constant 1 : i32
    %3 = arith.muli %arg0, %c1_i32 : i32
    %4 = arith.addi %3, %arg1 : i32
    %c0_i32_1 = arith.constant 0 : i32
    %5 = arith.cmpi eq, %4, %c0_i32_1 : i32
    %6 = arith.extui %5 : i1 to i32
    %c0_i32_2 = arith.constant 0 : i32
    %7 = arith.cmpi ne, %6, %c0_i32_2 : i32
    scf.if %7 {
      %cst = arith.constant 0.000000e+00 : f32
      %8 = vector.broadcast %cst : f32 to vector<64x128xf32>
      %c0_i32_3 = arith.constant 0 : i32
      %c512_i32 = arith.constant 512 : i32
      %9 = arith.muli %c0_i32_3, %c512_i32 : i32
      %10 = tpu.assume_multiple %9, 512 : i32
      %11 = arith.index_cast %10 : i32 to index
      %c0 = arith.constant 0 : index
      %12 = vector.load %arg2[%11, %c0] : memref<512x128xf32, #tpu.memory_space<vmem>>, vector<512x128xf32>
      %13 = arith.index_cast %10 : i32 to index
      %c0_4 = arith.constant 0 : index
      %14 = vector.load %arg3[%13, %c0_4] : memref<512x128xf32, #tpu.memory_space<vmem>>, vector<512x128xf32>
      %15 = arith.subf %12, %14 : vector<512x128xf32>
      %16 = tpu.iota {dimensions = array<i32: 0>} : vector<512x128xi32>
      %c16_i32 = arith.constant 16 : i32
      %17 = arith.subi %c16_i32, %9 : i32
      %18 = vector.broadcast %17 : i32 to vector<512x128xi32>
      %19 = arith.cmpi slt, %16, %18 : vector<512x128xi32>
      %cst_5 = arith.constant 0.000000e+00 : f32
      %20 = vector.broadcast %cst_5 : f32 to vector<512x128xf32>
      %21 = arith.select %19, %15, %20 : vector<512x128xi1>, vector<512x128xf32>
      %22 = arith.mulf %21, %21 : vector<512x128xf32>
      %23 = vector.extract_strided_slice %22 {offsets = [0, 0], sizes = [64, 128], strides = [1, 1]} : vector<512x128xf32> to vector<64x128xf32>
      %24 = vector.extract_strided_slice %22 {offsets = [64, 0], sizes = [64, 128], strides = [1, 1]} : vector<512x128xf32> to vector<64x128xf32>
      %25 = arith.addf %23, %24 : vector<64x128xf32>
      %26 = vector.extract_strided_slice %22 {offsets = [128, 0], sizes = [64, 128], strides = [1, 1]} : vector<512x128xf32> to vector<64x128xf32>
      %27 = arith.addf %25, %26 : vector<64x128xf32>
      %28 = vector.extract_strided_slice %22 {offsets = [192, 0], sizes = [64, 128], strides = [1, 1]} : vector<512x128xf32> to vector<64x128xf32>
      %29 = arith.addf %27, %28 : vector<64x128xf32>
      %30 = vector.extract_strided_slice %22 {offsets = [256, 0], sizes = [64, 128], strides = [1, 1]} : vector<512x128xf32> to vector<64x128xf32>
      %31 = arith.addf %29, %30 : vector<64x128xf32>
      %32 = vector.extract_strided_slice %22 {offsets = [320, 0], sizes = [64, 128], strides = [1, 1]} : vector<512x128xf32> to vector<64x128xf32>
      %33 = arith.addf %31, %32 : vector<64x128xf32>
      %34 = vector.extract_strided_slice %22 {offsets = [384, 0], sizes = [64, 128], strides = [1, 1]} : vector<512x128xf32> to vector<64x128xf32>
      %35 = arith.addf %33, %34 : vector<64x128xf32>
      %36 = vector.extract_strided_slice %22 {offsets = [448, 0], sizes = [64, 128], strides = [1, 1]} : vector<512x128xf32> to vector<64x128xf32>
      %37 = arith.addf %35, %36 : vector<64x128xf32>
      %38 = arith.addf %8, %37 : vector<64x128xf32>
      %c1_i32_6 = arith.constant 1 : i32
      %c0_7 = arith.constant 0 : index
      %c0_8 = arith.constant 0 : index
      %c0_9 = arith.constant 0 : index
      %39 = vector.load %arg4[%c0_7, %c0_8, %c0_9] : memref<1x64x128xf32, #tpu.memory_space<vmem>>, vector<1x64x128xf32>
      %40 = vector.shape_cast %38 : vector<64x128xf32> to vector<1x64x128xf32>
      %41 = arith.addf %39, %40 : vector<1x64x128xf32>
      %c0_10 = arith.constant 0 : index
      %c0_11 = arith.constant 0 : index
      %c0_12 = arith.constant 0 : index
      %42 = vector.load %arg4[%c0_10, %c0_11, %c0_12] : memref<1x64x128xf32, #tpu.memory_space<vmem>>, vector<1x64x128xf32>
      tpu.vector_store %arg4[%c0_10, %c0_11, %c0_12], %41 {strides = array<i32>} : memref<1x64x128xf32, #tpu.memory_space<vmem>>, vector<1x64x128xf32>,
    } else {
    }
    return
  }
  func.func @transform_0(%arg0: i32, %arg1: i32) -> (i32, i32) {
    %c1_i32 = arith.constant 1 : i32
    %0 = arith.muli %arg0, %c1_i32 : i32
    %1 = arith.addi %0, %arg1 : i32
    %c0_i32 = arith.constant 0 : i32
    %c0_i32_0 = arith.constant 0 : i32
    return %1, %c0_i32 : i32, i32
  }
  func.func @transform_1(%arg0: i32, %arg1: i32) -> (i32, i32) {
    %c1_i32 = arith.constant 1 : i32
    %0 = arith.muli %arg0, %c1_i32 : i32
    %1 = arith.addi %0, %arg1 : i32
    %c0_i32 = arith.constant 0 : i32
    %c0_i32_0 = arith.constant 0 : i32
    return %1, %c0_i32 : i32, i32
  }
  func.func @transform_2(%arg0: i32, %arg1: i32) -> (i32, i32, i32) {
    %c0_i32 = arith.constant 0 : i32
    %c0_i32_0 = arith.constant 0 : i32
    %c0_i32_1 = arith.constant 0 : i32
    return %arg0, %c0_i32, %c0_i32_0 : i32, i32, i32
  }
}

</mosaic_0001>

<bundles_post_ra>
// kernel: pallas_loss.1
= control target key start
LH: loop header
LB: loop body
LE: loop exit
PB: predicated region body
PF: predicated region fallthrough
CT: control target
= control target key end

     0   :  { %v646_v3 = vmov 0.0   ;;  %s698_s2 = inlined_call_operand.vmem [shape: f32[1,64,128], index: 2, kind: output, shape index: {}]   ;;  %s699_s0 = inlined_call_operand.vmem [shape: f32[16,128], index: 0, kind: input, shape index: {}]   ;;  %s700_s1 = inlined_call_operand.vmem [shape: f32[16,128], index: 1, kind: input, shape index: {}]  }
   0x1   :  { %v92_v0 = vld [vmem:[%s699_s0] sm:$0xff]  ;;  %v93_v2 = vld [vmem:[%s699_s0 + $0x8] sm:$0xff]  ;;  %623 = vst [vmem:[%s698_s2 + $0x10] sm:$0xff] %v646_v3  ;;  %624 = vst [vmem:[%s698_s2 + $0x18] sm:$0xff] %v646_v3 }
   0x2   :  { %v156_v1 = vld [vmem:[%s700_s1] sm:$0xff]  ;;  %625 = vst [vmem:[%s698_s2 + $0x20] sm:$0xff] %v646_v3  ;;  %626 = vst [vmem:[%s698_s2 + $0x28] sm:$0xff] %v646_v3  ;;  %v157_v5 = vld [vmem:[%s700_s1 + $0x8] sm:$0xff] }
   0x3   :  { %627 = vst [vmem:[%s698_s2 + $0x30] sm:$0xff] %v646_v3  ;;  %628 = vst [vmem:[%s698_s2 + $0x38] sm:$0xff] %v646_v3  ;;  %v220_v4 = vsub.f32 %v92_v0, %v156_v1  ;;  %v221_v6 = vsub.f32 %v93_v2, %v157_v5 }
   0x5   :  { %v477_v7 = vmul.f32 %v220_v4, %v220_v4  ;;  %v478_v8 = vmul.f32 %v221_v6, %v221_v6 }
   0x7   :  { %621 = vst [vmem:[%s698_s2] sm:$0xff] %v477_v7  ;;  %622 = vst [vmem:[%s698_s2 + $0x8] sm:$0xff] %v478_v8 }

</bundles_post_ra>
